<compile_context>
chip_gen: v5e
topology: v5e:2x2
jax: 0.10.0
libtpu: 0.0.40
codegen_flags: <defaults>
</compile_context>

<pallas_src>
import functools

import jax
import jax.numpy as jnp
import numpy as np
from jax import lax
from jax.experimental import pallas as pl
from jax.experimental.pallas import tpu as pltpu


_NUM_PARTIALS = 2   # v7x has 2 TensorCores/chip; harmless (one extra small block) on v5e/v6e.


def _cdiv(a, b):
    return -(-a // b)


# ---------------------------------------------------------------------------
# shift-by-one helper: pltpu.roll with a one-time convention probe, concat fallback
# ---------------------------------------------------------------------------
@functools.lru_cache(maxsize=None)
def _shift_mode(R, L):
    """Determine how to express y[i] = x[i+1] on an (R, L) tile."""

    def probe(o_col_ref, o_row_ref):
        col = lax.broadcasted_iota(jnp.float32, (R, L), 1)
        row = lax.broadcasted_iota(jnp.float32, (R, L), 0)
        o_col_ref[...] = pltpu.roll(col, L - 1, axis=1)
        o_row_ref[...] = pltpu.roll(row, R - 1, axis=0)

    try:
        oc, orow = pl.pallas_call(
            probe,
            out_shape=(jax.ShapeDtypeStruct((R, L), jnp.float32),
                       jax.ShapeDtypeStruct((R, L), jnp.float32)))()
        oc = np.asarray(jax.block_until_ready(oc))
        orow = np.asarray(jax.block_until_ready(orow))
        if oc[0, 0] == 1.0 and orow[0, 0] == 1.0:
            return "roll_nm1"          # jnp.roll convention: roll(x, n-1) -> x[i+1]
        if oc[0, 0] == float(L - 1) and orow[0, 0] == float(R - 1):
            return "roll_p1"           # opposite convention: roll(x, 1) -> x[i+1]
    except Exception:
        pass
    return "concat"                    # proven fallback: slice + concatenate


def _shift_next(x, axis, mode):
    """y[..., i, ...] = x[..., i+1, ...]; wrapped last entry is always masked by callers."""
    n = x.shape[axis]
    if mode == "roll_nm1":
        return pltpu.roll(x, n - 1, axis=axis)
    if mode == "roll_p1":
        return pltpu.roll(x, 1, axis=axis)
    if axis in (1, -1):
        return jnp.concatenate([x[:, 1:], x[:, :1]], axis=1)
    return jnp.concatenate([x[1:, :], x[:1, :]], axis=0)


def _pow_norm(sq, power):
    """(dh^2 + dw^2) ** (power / 2), with cheap special cases (power==2 skips the sqrt)."""
    if power == 2:
        return sq
    if power == 1:
        return jnp.sqrt(sq)
    if isinstance(power, int) and power % 2 == 0:
        return sq ** (power // 2)
    return jnp.sqrt(sq) ** power


# ---------------------------------------------------------------------------
# kernel
# ---------------------------------------------------------------------------
def _masked_tv_kernel(a_ref, t_ref, out_ref, acc_ref, *, H, W, power, sx, sy, shift):
    i = pl.program_id(1)
    n_inner = pl.num_programs(1)

    @pl.when(i == 0)
    def _():
        acc_ref[...] = jnp.zeros_like(acc_ref)

    a = a_ref[0].astype(jnp.float32)   # (R, L): bg slices along rows, bw slices along lanes
    t = t_ref[0].astype(jnp.float32)
    R, L = a.shape

    out = t / jnp.maximum(a, 1e-6)
    # NOTE: `out*depth_mask + out.detach()*(1-depth_mask)` == out in the forward pass,
    # so the 3x3 min-pool depth mask is omitted here entirely.
    # TODO(synk): a custom_vjp backward kernel would need the depth mask for the detach.

    rowm = lax.broadcasted_iota(jnp.int32, (R, L), 0) % H     # in-slice row
    colm = lax.broadcasted_iota(jnp.int32, (R, L), 1) % W     # in-slice col
    zero = jnp.zeros((), jnp.float32)

    nxt = functools.partial(_shift_next, mode=shift)

    # dx[h, w] = out[h, w] - out[h, w+1]   (valid for w <= W-2; stays within a packed slice)
    dx = jnp.where(colm <= W - 2, out - nxt(out, 1), zero)
    # dy[h, w] = out[h, w] - out[h+1, w]   (valid for h <= H-2)
    dy = jnp.where(rowm <= H - 2, out - nxt(out, 0), zero)

    # term 1: TV of dx on the (H, W-1) grid with zero-padded diffs along H and W.
    dh = jnp.where(rowm <= H - 2, nxt(dx, 0) - dx, zero)
    dw = jnp.where(colm <= W - 3, nxt(dx, 1) - dx, zero)
    s1 = dh * dh + dw * dw          # already 0 outside the valid (H, W-1) domain

    # term 2: TV of dy on the (H-1, W) grid.
    dh2 = jnp.where(rowm <= H - 3, nxt(dy, 0) - dy, zero)
    dw2 = jnp.where(colm <= W - 2, nxt(dy, 1) - dy, zero)
    s2 = dh2 * dh2 + dw2 * dw2

    # Pre-scaled elementwise accumulation (pure VPU); cross-lane reduce deferred to epilogue.
    acc_ref[...] += _pow_norm(s1, power) * sx + _pow_norm(s2, power) * sy

    @pl.when(i == n_inner - 1)
    def _():
        tot = jnp.sum(jnp.sum(acc_ref[...], axis=1, keepdims=True),
                      axis=0, keepdims=True)                   # (1, 1)
        out_ref[...] = jnp.broadcast_to(tot.reshape(1, 1, 1), out_ref.shape)


# ---------------------------------------------------------------------------
# wrapper
# ---------------------------------------------------------------------------
def _vmem_capacity_bytes():
    try:
        return int(pltpu.get_tpu_info().vmem_capacity_bytes)
    except Exception:
        return 64 * 2**20              # conservative default: v7x per-TensorCore VMEM


def masked_tv_loss(alpha, tensor, dims=(-2, -1), power=1, loss_weight=1.0):
    """Pallas implementation of MaskedTVLoss.forward (weight=None / avg_factor=None path)."""
    assert tuple(dims) in ((-2, -1), (2, 3)), "only spatial dims are supported"
    assert tensor.shape == alpha.shape
    # TODO(synk): the weight / avg_factor branches of @weighted_loss are not implemented.
    N, C, H, W = alpha.shape
    assert H >= 2 and W >= 2, "TV loss needs at least a 2x2 spatial extent"
    nc = N * C

    # Keep bf16/f32 inputs as-is through the DMA; cast to f32 inside the kernel.
    if alpha.dtype in (np.dtype(np.float32), np.dtype(jnp.bfloat16)):
        work_dtype = alpha.dtype
    else:
        work_dtype = np.dtype(np.float32)

    # ---- tile-shape selection (per-generation VMEM aware) ---------------------------
    vmem_cap = _vmem_capacity_bytes()
    blk_budget = int(max(64 * 1024, min(4 * 2**20, vmem_cap // 48)))

    bw = 1 if W >= 128 else _cdiv(128, W)            # lane-pack slices so L >= 128
    L = bw * W
    row_groups = _cdiv(nc, bw)                       # groups of bw lane-packed slices
    bg_cap = max(1, blk_budget // (H * L * 4))
    bg = max(1, min(bg_cap, _cdiv(row_groups, _NUM_PARTIALS)))   # keep both cores busy
    R = bg * H
    # TODO(synk): slices with H*W*4B >> blk_budget still go one-per-block (no halo tiling).

    n_blocks = _cdiv(row_groups, bg)
    n_blocks = _cdiv(n_blocks, _NUM_PARTIALS) * _NUM_PARTIALS
    n_inner = n_blocks // _NUM_PARTIALS
    total_slices = n_blocks * bg * bw
    pad_n = total_slices - nc

    a2 = alpha.reshape(nc, H, W).astype(work_dtype)
    t2 = tensor.reshape(nc, H, W).astype(work_dtype)
    if pad_n:
        # padding slices (alpha=1, tensor=0) contribute exactly 0 to every term.
        a2 = jnp.concatenate([a2, jnp.ones((pad_n, H, W), work_dtype)], axis=0)
        t2 = jnp.concatenate([t2, jnp.zeros((pad_n, H, W), work_dtype)], axis=0)

    def _pack(x):   # (n_blocks*bg*bw, H, W) -> (n_blocks, bg*H, bw*W)
        x = x.reshape(n_blocks, bg, bw, H, W)
        x = x.transpose(0, 1, 3, 2, 4)               # (n_blocks, bg, H, bw, W)
        return x.reshape(n_blocks, R, L)

    a3 = _pack(a2)
    t3 = _pack(t2)

    shift = _shift_mode(R, L)

    blk_f32 = R * L * 4
    vmem_limit = int(min(vmem_cap // 2, max(32 * 2**20, 16 * blk_f32 + 4 * 2**20)))

    kernel = functools.partial(
        _masked_tv_kernel, H=H, W=W, power=power,
        sx=float(loss_weight) / (H * (W - 1) * nc),
        sy=float(loss_weight) / ((H - 1) * W * nc),
        shift=shift)

    # If xprof ever shows exposed DMA on v5e, add pipeline_mode=pl.Buffered(3) here.
    in_spec = pl.BlockSpec((1, R, L), lambda c, i: (c * n_inner + i, 0, 0))

    partials = pl.pallas_call(
        kernel,
        out_shape=jax.ShapeDtypeStruct((_NUM_PARTIALS, 8, 128), jnp.float32),
        grid_spec=pltpu.PrefetchScalarGridSpec(
            num_scalar_prefetch=0,
            grid=(_NUM_PARTIALS, n_inner),
            in_specs=[in_spec, in_spec],
            out_specs=pl.BlockSpec((1, 8, 128), lambda c, i: (c, 0, 0)),
            scratch_shapes=[pltpu.VMEM((R, L), jnp.float32)],
        ),
        compiler_params=pltpu.CompilerParams(
            dimension_semantics=("parallel", "arbitrary"),
            vmem_limit_bytes=vmem_limit),
    )(a3, t3)

    return jnp.sum(partials[:, 0, 0])


# ---------------------------------------------------------------------------
# pure-JAX reference (faithful to the PyTorch module, for verification)
# ---------------------------------------------------------------------------
def _tv_loss_ref(t, dims=(-2, -1), power=1):
    diffs = []
    for dim in dims:
        d = jnp.diff(t, axis=dim)
        pad = [(0, 0)] * t.ndim
        pad[dim] = (0, 1)
        diffs.append(jnp.pad(d, pad))
    norm = jnp.sqrt(sum(x * x for x in diffs))
    return jnp.mean(norm ** power, axis=dims)


def _ref_forward(alpha, tensor, power=1, loss_weight=1.0):
    N, C, H, W = alpha.shape
    ap = jnp.pad(alpha, ((0, 0), (0, 0), (1, 1), (1, 1)), constant_values=jnp.inf)
    wins = [ap[..., i:i + H, j:j + W] for i in range(3) for j in range(3)]
    mask = functools.reduce(jnp.minimum, wins)       # == -max_pool2d(-alpha, 3, 1, 1)
    out = tensor / jnp.maximum(alpha, 1e-6)
    out = out * mask + out * (1.0 - mask)            # identity in fwd (kept for fidelity)
    dx = out[..., :, :-1] - out[..., :, 1:]
    dy = out[..., :-1, :] - out[..., 1:, :]
    return (jnp.mean(_tv_loss_ref(dx, power=power)) +
            jnp.mean(_tv_loss_ref(dy, power=power))) * loss_weight


if __name__ == "__main__":
    key = jax.random.PRNGKey(0)
    k1, k2, k3, k4 = jax.random.split(key, 4)

    # case 1: default power, shapes from the spec (exercises lane packing + padding block)
    N, C, H, W = 2, 4, 16, 16
    alpha = jax.random.uniform(k1, (N, C, H, W), jnp.float32, 0.3, 1.0)
    tensor = jax.random.uniform(k2, (N, C, H, W), jnp.float32, -1.0, 1.0)
    got = jax.block_until_ready(
        masked_tv_loss(alpha, tensor, dims=(-2, -1), power=1, loss_weight=1.0))
    want = _ref_forward(alpha, tensor, power=1, loss_weight=1.0)
    np.testing.assert_allclose(np.asarray(got), np.asarray(want), rtol=2e-4, atol=1e-5)

    # case 2: odd channel count, power=2, loss_weight != 1 (exercises sublane batching + padding)
    N, C, H, W = 3, 5, 8, 32
    alpha = jax.random.uniform(k3, (N, C, H, W), jnp.float32, 0.3, 1.0)
    tensor = jax.random.uniform(k4, (N, C, H, W), jnp.float32, -1.0, 1.0)
    got = jax.block_until_ready(
        masked_tv_loss(alpha, tensor, dims=(-2, -1), power=2, loss_weight=0.5))
    want = _ref_forward(alpha, tensor, power=2, loss_weight=0.5)
    np.testing.assert_allclose(np.asarray(got), np.asarray(want), rtol=2e-4, atol=1e-5)

    print("KERNEL_OK")
</pallas_src>

<mosaic_0001>
module attributes {stable_mosaic.version = 11 : i64} {
  func.func @_masked_tv_kernel(%arg0: i32, %arg1: i32, %arg2: memref<1x16x128xf32, #tpu.memory_space<vmem>>, %arg3: memref<1x16x128xf32, #tpu.memory_space<vmem>>, %arg4: memref<1x8x128xf32, #tpu.memory_space<vmem>>, %arg5: memref<16x128xf32, #tpu.memory_space<vmem>>) attributes {dimension_semantics = [#tpu.dimension_semantics<parallel>, #tpu.dimension_semantics<arbitrary>], iteration_bounds = array<i64: 2, 1>, scalar_prefetch = 0 : i64, scratch_operands = 1 : i64, tpu.core_type = #tpu.core_type<tc>, window_params = [{transform_indices = @transform_0, window_bounds = array<i64: 1, 16, 128>}, {transform_indices = @transform_1, window_bounds = array<i64: 1, 16, 128>}, {transform_indices = @transform_2, window_bounds = array<i64: 1, 8, 128>}]} {
    %c0_i32 = arith.constant 0 : i32
    %0 = arith.cmpi eq, %arg1, %c0_i32 : i32
    %1 = arith.extui %0 : i1 to i32
    %c0_i32_0 = arith.constant 0 : i32
    %2 = arith.cmpi ne, %1, %c0_i32_0 : i32
    scf.if %2 {
      %cst_34 = arith.constant 0.000000e+00 : f32
      %111 = vector.broadcast %cst_34 : f32 to vector<16x128xf32>
      %c0_35 = arith.constant 0 : index
      %c0_36 = arith.constant 0 : index
      %112 = vector.load %arg5[%c0_35, %c0_36] : memref<16x128xf32, #tpu.memory_space<vmem>>, vector<16x128xf32>
      tpu.vector_store %arg5[%c0_35, %c0_36], %111 {strides = array<i32>} : memref<16x128xf32, #tpu.memory_space<vmem>>, vector<16x128xf32>,
    } else {
    }
    %c0 = arith.constant 0 : index
    %c0_1 = arith.constant 0 : index
    %c0_2 = arith.constant 0 : index
    %3 = vector.load %arg2[%c0, %c0_1, %c0_2] : memref<1x16x128xf32, #tpu.memory_space<vmem>>, vector<1x16x128xf32>
    %4 = vector.shape_cast %3 : vector<1x16x128xf32> to vector<16x128xf32>
    %c0_3 = arith.constant 0 : index
    %c0_4 = arith.constant 0 : index
    %c0_5 = arith.constant 0 : index
    %5 = vector.load %arg3[%c0_3, %c0_4, %c0_5] : memref<1x16x128xf32, #tpu.memory_space<vmem>>, vector<1x16x128xf32>
    %6 = vector.shape_cast %5 : vector<1x16x128xf32> to vector<16x128xf32>
    %cst = arith.constant 9.99999997E-7 : f32
    %7 = vector.broadcast %cst : f32 to vector<16x128xf32>
    %8 = arith.maximumf %4, %7 : vector<16x128xf32>
    %9 = arith.divf %6, %8 : vector<16x128xf32>
    %10 = tpu.iota {dimensions = array<i32: 0>} : vector<16x128xi32>
    %c16_i32 = arith.constant 16 : i32
    %c0_i32_6 = arith.constant 0 : i32
    %11 = arith.cmpi eq, %c16_i32, %c0_i32_6 : i32
    %c1_i32 = arith.constant 1 : i32
    %12 = arith.select %11, %c1_i32, %c16_i32 : i32
    %13 = vector.broadcast %12 : i32 to vector<16x128xi32>
    %14 = arith.remsi %10, %13 : vector<16x128xi32>
    %c0_i32_7 = arith.constant 0 : i32
    %15 = vector.broadcast %c0_i32_7 : i32 to vector<16x128xi32>
    %16 = arith.cmpi ne, %14, %15 : vector<16x128xi32>
    %c0_i32_8 = arith.constant 0 : i32
    %17 = vector.broadcast %c0_i32_8 : i32 to vector<16x128xi32>
    %18 = arith.cmpi slt, %14, %17 : vector<16x128xi32>
    %c0_i32_9 = arith.constant 0 : i32
    %19 = arith.cmpi slt, %12, %c0_i32_9 : i32
    %20 = vector.broadcast %19 : i1 to vector<16x128xi1>
    %21 = vector.broadcast %20 : vector<16x128xi1> to vector<16x128xi1>
    %22 = arith.xori %18, %21 : vector<16x128xi1>
    %23 = arith.andi %22, %16 : vector<16x128xi1>
    %24 = vector.broadcast %12 : i32 to vector<16x128xi32>
    %25 = arith.addi %14, %24 : vector<16x128xi32>
    %26 = arith.select %23, %25, %14 : vector<16x128xi1>, vector<16x128xi32>
    %27 = tpu.iota {dimensions = array<i32: 1>} : vector<16x128xi32>
    %c16_i32_10 = arith.constant 16 : i32
    %c0_i32_11 = arith.constant 0 : i32
    %28 = arith.cmpi eq, %c16_i32_10, %c0_i32_11 : i32
    %c1_i32_12 = arith.constant 1 : i32
    %29 = arith.select %28, %c1_i32_12, %c16_i32_10 : i32
    %30 = vector.broadcast %29 : i32 to vector<16x128xi32>
    %31 = arith.remsi %27, %30 : vector<16x128xi32>
    %c0_i32_13 = arith.constant 0 : i32
    %32 = vector.broadcast %c0_i32_13 : i32 to vector<16x128xi32>
    %33 = arith.cmpi ne, %31, %32 : vector<16x128xi32>
    %c0_i32_14 = arith.constant 0 : i32
    %34 = vector.broadcast %c0_i32_14 : i32 to vector<16x128xi32>
    %35 = arith.cmpi slt, %31, %34 : vector<16x128xi32>
    %c0_i32_15 = arith.constant 0 : i32
    %36 = arith.cmpi slt, %29, %c0_i32_15 : i32
    %37 = vector.broadcast %36 : i1 to vector<16x128xi1>
    %38 = vector.broadcast %37 : vector<16x128xi1> to vector<16x128xi1>
    %39 = arith.xori %35, %38 : vector<16x128xi1>
    %40 = arith.andi %39, %33 : vector<16x128xi1>
    %41 = vector.broadcast %29 : i32 to vector<16x128xi32>
    %42 = arith.addi %31, %41 : vector<16x128xi32>
    %43 = arith.select %40, %42, %31 : vector<16x128xi1>, vector<16x128xi32>
    %c14_i32 = arith.constant 14 : i32
    %44 = vector.broadcast %c14_i32 : i32 to vector<16x128xi32>
    %45 = arith.cmpi sle, %43, %44 : vector<16x128xi32>
    %46 = vector.extract_strided_slice %9 {offsets = [0, 1], sizes = [16, 127], strides = [1, 1]} : vector<16x128xf32> to vector<16x127xf32>
    %47 = vector.extract_strided_slice %9 {offsets = [0, 0], sizes = [16, 1], strides = [1, 1]} : vector<16x128xf32> to vector<16x1xf32>
    %48 = tpu.concatenate %46, %47 in 1 : vector<16x127xf32>, vector<16x1xf32> -> vector<16x128xf32>
    %49 = arith.subf %9, %48 : vector<16x128xf32>
    %cst_16 = arith.constant 0.000000e+00 : f32
    %50 = vector.broadcast %cst_16 : f32 to vector<16x128xf32>
    %51 = arith.select %45, %49, %50 : vector<16x128xi1>, vector<16x128xf32>
    %c14_i32_17 = arith.constant 14 : i32
    %52 = vector.broadcast %c14_i32_17 : i32 to vector<16x128xi32>
    %53 = arith.cmpi sle, %26, %52 : vector<16x128xi32>
    %54 = vector.extract_strided_slice %9 {offsets = [1, 0], sizes = [15, 128], strides = [1, 1]} : vector<16x128xf32> to vector<15x128xf32>
    %55 = vector.extract_strided_slice %9 {offsets = [0, 0], sizes = [1, 128], strides = [1, 1]} : vector<16x128xf32> to vector<1x128xf32>
    %56 = tpu.concatenate %54, %55 in 0 : vector<15x128xf32>, vector<1x128xf32> -> vector<16x128xf32>
    %57 = arith.subf %9, %56 : vector<16x128xf32>
    %cst_18 = arith.constant 0.000000e+00 : f32
    %58 = vector.broadcast %cst_18 : f32 to vector<16x128xf32>
    %59 = arith.select %53, %57, %58 : vector<16x128xi1>, vector<16x128xf32>
    %c14_i32_19 = arith.constant 14 : i32
    %60 = vector.broadcast %c14_i32_19 : i32 to vector<16x128xi32>
    %61 = arith.cmpi sle, %26, %60 : vector<16x128xi32>
    %62 = vector.extract_strided_slice %51 {offsets = [1, 0], sizes = [15, 128], strides = [1, 1]} : vector<16x128xf32> to vector<15x128xf32>
    %63 = vector.extract_strided_slice %51 {offsets = [0, 0], sizes = [1, 128], strides = [1, 1]} : vector<16x128xf32> to vector<1x128xf32>
    %64 = tpu.concatenate %62, %63 in 0 : vector<15x128xf32>, vector<1x128xf32> -> vector<16x128xf32>
    %65 = arith.subf %64, %51 : vector<16x128xf32>
    %cst_20 = arith.constant 0.000000e+00 : f32
    %66 = vector.broadcast %cst_20 : f32 to vector<16x128xf32>
    %67 = arith.select %61, %65, %66 : vector<16x128xi1>, vector<16x128xf32>
    %c13_i32 = arith.constant 13 : i32
    %68 = vector.broadcast %c13_i32 : i32 to vector<16x128xi32>
    %69 = arith.cmpi sle, %43, %68 : vector<16x128xi32>
    %70 = vector.extract_strided_slice %51 {offsets = [0, 1], sizes = [16, 127], strides = [1, 1]} : vector<16x128xf32> to vector<16x127xf32>
    %71 = vector.extract_strided_slice %51 {offsets = [0, 0], sizes = [16, 1], strides = [1, 1]} : vector<16x128xf32> to vector<16x1xf32>
    %72 = tpu.concatenate %70, %71 in 1 : vector<16x127xf32>, vector<16x1xf32> -> vector<16x128xf32>
    %73 = arith.subf %72, %51 : vector<16x128xf32>
    %cst_21 = arith.constant 0.000000e+00 : f32
    %74 = vector.broadcast %cst_21 : f32 to vector<16x128xf32>
    %75 = arith.select %69, %73, %74 : vector<16x128xi1>, vector<16x128xf32>
    %76 = arith.mulf %67, %67 : vector<16x128xf32>
    %77 = arith.mulf %75, %75 : vector<16x128xf32>
    %78 = arith.addf %76, %77 : vector<16x128xf32>
    %c13_i32_22 = arith.constant 13 : i32
    %79 = vector.broadcast %c13_i32_22 : i32 to vector<16x128xi32>
    %80 = arith.cmpi sle, %26, %79 : vector<16x128xi32>
    %81 = vector.extract_strided_slice %59 {offsets = [1, 0], sizes = [15, 128], strides = [1, 1]} : vector<16x128xf32> to vector<15x128xf32>
    %82 = vector.extract_strided_slice %59 {offsets = [0, 0], sizes = [1, 128], strides = [1, 1]} : vector<16x128xf32> to vector<1x128xf32>
    %83 = tpu.concatenate %81, %82 in 0 : vector<15x128xf32>, vector<1x128xf32> -> vector<16x128xf32>
    %84 = arith.subf %83, %59 : vector<16x128xf32>
    %cst_23 = arith.constant 0.000000e+00 : f32
    %85 = vector.broadcast %cst_23 : f32 to vector<16x128xf32>
    %86 = arith.select %80, %84, %85 : vector<16x128xi1>, vector<16x128xf32>
    %c14_i32_24 = arith.constant 14 : i32
    %87 = vector.broadcast %c14_i32_24 : i32 to vector<16x128xi32>
    %88 = arith.cmpi sle, %43, %87 : vector<16x128xi32>
    %89 = vector.extract_strided_slice %59 {offsets = [0, 1], sizes = [16, 127], strides = [1, 1]} : vector<16x128xf32> to vector<16x127xf32>
    %90 = vector.extract_strided_slice %59 {offsets = [0, 0], sizes = [16, 1], strides = [1, 1]} : vector<16x128xf32> to vector<16x1xf32>
    %91 = tpu.concatenate %89, %90 in 1 : vector<16x127xf32>, vector<16x1xf32> -> vector<16x128xf32>
    %92 = arith.subf %91, %59 : vector<16x128xf32>
    %cst_25 = arith.constant 0.000000e+00 : f32
    %93 = vector.broadcast %cst_25 : f32 to vector<16x128xf32>
    %94 = arith.select %88, %92, %93 : vector<16x128xi1>, vector<16x128xf32>
    %95 = arith.mulf %86, %86 : vector<16x128xf32>
    %96 = arith.mulf %94, %94 : vector<16x128xf32>
    %97 = arith.addf %95, %96 : vector<16x128xf32>
    %c0_26 = arith.constant 0 : index
    %c0_27 = arith.constant 0 : index
    %98 = vector.load %arg5[%c0_26, %c0_27] : memref<16x128xf32, #tpu.memory_space<vmem>>, vector<16x128xf32>
    %99 = math.sqrt %78 : vector<16x128xf32>
    %cst_28 = arith.constant 5.2083336E-4 : f32
    %100 = vector.broadcast %cst_28 : f32 to vector<16x128xf32>
    %101 = arith.mulf %99, %100 : vector<16x128xf32>
    %102 = math.sqrt %97 : vector<16x128xf32>
    %cst_29 = arith.constant 5.2083336E-4 : f32
    %103 = vector.broadcast %cst_29 : f32 to vector<16x128xf32>
    %104 = arith.mulf %102, %103 : vector<16x128xf32>
    %105 = arith.addf %101, %104 : vector<16x128xf32>
    %106 = arith.addf %98, %105 : vector<16x128xf32>
    %c0_30 = arith.constant 0 : index
    %c0_31 = arith.constant 0 : index
    %107 = vector.load %arg5[%c0_30, %c0_31] : memref<16x128xf32, #tpu.memory_space<vmem>>, vector<16x128xf32>
    tpu.vector_store %arg5[%c0_30, %c0_31], %106 {strides = array<i32>} : memref<16x128xf32, #tpu.memory_space<vmem>>, vector<16x128xf32>,
    %c0_i32_32 = arith.constant 0 : i32
    %108 = arith.cmpi eq, %arg1, %c0_i32_32 : i32
    %109 = arith.extui %108 : i1 to i32
    %c0_i32_33 = arith.constant 0 : i32
    %110 = arith.cmpi ne, %109, %c0_i32_33 : i32
    scf.if %110 {
      %c0_34 = arith.constant 0 : index
      %c0_35 = arith.constant 0 : index
      %111 = vector.load %arg5[%c0_34, %c0_35] : memref<16x128xf32, #tpu.memory_space<vmem>>, vector<16x128xf32>
      %cst_36 = arith.constant dense<0.000000e+00> : vector<16xf32>
      %112 = vector.multi_reduction <add>, %111, %cst_36 [1] : vector<16x128xf32> to vector<16xf32>
      %113 = vector.shape_cast %112 : vector<16xf32> to vector<16x1xf32>
      %cst_37 = arith.constant dense<0.000000e+00> : vector<1xf32>
      %114 = vector.multi_reduction <add>, %113, %cst_37 [0] : vector<16x1xf32> to vector<1xf32>
      %115 = vector.shape_cast %114 : vector<1xf32> to vector<1x1xf32>
      %116 = vector.shape_cast %115 : vector<1x1xf32> to vector<1x1x1xf32>
      %117 = vector.shape_cast %116 : vector<1x1x1xf32> to vector<1x1x1xf32>
      %118 = vector.broadcast %117 : vector<1x1x1xf32> to vector<1x8x128xf32>
      %c0_38 = arith.constant 0 : index
      %c0_39 = arith.constant 0 : index
      %c0_40 = arith.constant 0 : index
      %119 = vector.load %arg4[%c0_38, %c0_39, %c0_40] : memref<1x8x128xf32, #tpu.memory_space<vmem>>, vector<1x8x128xf32>
      tpu.vector_store %arg4[%c0_38, %c0_39, %c0_40], %118 {strides = array<i32>} : memref<1x8x128xf32, #tpu.memory_space<vmem>>, vector<1x8x128xf32>,
    } else {
    }
    return
  }
  func.func @transform_0(%arg0: i32, %arg1: i32) -> (i32, i32, i32) {
    %c1_i32 = arith.constant 1 : i32
    %0 = arith.muli %arg0, %c1_i32 : i32
    %1 = arith.addi %0, %arg1 : i32
    %c0_i32 = arith.constant 0 : i32
    %c0_i32_0 = arith.constant 0 : i32
    %c0_i32_1 = arith.constant 0 : i32
    return %1, %c0_i32, %c0_i32_0 : i32, i32, i32
  }
  func.func @transform_1(%arg0: i32, %arg1: i32) -> (i32, i32, i32) {
    %c1_i32 = arith.constant 1 : i32
    %0 = arith.muli %arg0, %c1_i32 : i32
    %1 = arith.addi %0, %arg1 : i32
    %c0_i32 = arith.constant 0 : i32
    %c0_i32_0 = arith.constant 0 : i32
    %c0_i32_1 = arith.constant 0 : i32
    return %1, %c0_i32, %c0_i32_0 : i32, i32, i32
  }
  func.func @transform_2(%arg0: i32, %arg1: i32) -> (i32, i32, i32) {
    %c0_i32 = arith.constant 0 : i32
    %c0_i32_0 = arith.constant 0 : i32
    %c0_i32_1 = arith.constant 0 : i32
    return %arg0, %c0_i32, %c0_i32_0 : i32, i32, i32
  }
}

</mosaic_0001>

<bundles_post_ra>
// kernel: tpu_custom_call.1
= control target key start
LH: loop header
LB: loop body
LE: loop exit
PB: predicated region body
PF: predicated region fallthrough
CT: control target
= control target key end

     0   :  { %7 = vsyncpa [#allocation4], 0  ;;  %s1056_s0 = inlined_call_operand.hbm [shape: f32[2,16,128], index: 0, kind: input, shape index: {}]   ;;  %s1057_s1 = inlined_call_operand.hbm [shape: f32[2,16,128], index: 1, kind: input, shape index: {}]   ;;  %s1058_s2 = inlined_call_operand.hbm [shape: f32[2,8,128], index: 2, kind: output, shape index: {}]  }
   0x1   :  { %9 = vsyncpa [#allocation4 + $0x1], 0 }
   0x2   :  { %10 = vsyncpa [#allocation7], 0 }
   0x3   :  { %12 = vsyncpa [#allocation7 + $0x1], 0 }
   0x4   :  { %13 = vsyncpa [#allocation5], 0 }
   0x5   :  { %15 = vsyncpa [#allocation5 + $0x1], 0  ;;  %s861_s9 = smov 0   ;;  %s863_s10 = smov 0  }
   0x6   :  { %s865_s11 = smov 0   ;;  %s867_s12 = smov 0  }
   0x7   :  { %s869_s13 = smov 0   ;;  %s871_s14 = smov 0  }
   0x8 LB: > { %s593_s15 = sadd.s32 4294967295, %s841_s14   ;;  %s594_s16 = sadd.s32 4294967294, %s841_s14   ;;  %s841_s14 = sphi %s871_s14, %s21_s14   ;;  %s837_s13 = sphi %s869_s13, %s1074_s13   ;;  %s833_s12 = sphi %s867_s12, %s1073_s12   ;;  %s829_s11 = sphi %s865_s11, %s1072_s11   ;;  %s825_s10 = sphi %s863_s10, %s1071_s10   ;;  %s821_s9 = sphi %s861_s9, %s1070_s9  }
   0x9   : > { %s33_s17 = sadd.s32 1, %s837_s13  ;;  %s42_s18 = sadd.s32 1, %s829_s11 }
   0xa   : > { %p35_p0 = scmp.ge.s32.totalorder %s33_s17, 2  ;;  %p49_p1 = scmp.ne.s32.totalorder %s829_s11, %s825_s10 }
   0xb   : > { %p50_p2 = scmp.eq.s32.totalorder %s841_s14, 0  ;;  %p55_p3 = scmp.ne.s32.totalorder %s825_s10, %s821_s9 }
   0xc   : > { %s1076_s17 = smov (%p35_p0, %s33_s17), 0  ;;  %p56_p5 = scmp.eq.s32.totalorder %s593_s15, 0 }
   0xd   : > { %p902_p4 = por %p50_p2, %p49_p1  ;;  %s39_s20 = ssub.s32 %s837_s13, %s1076_s17 }
   0xe   : > { %p107_p6 = scmp.eq.s32.totalorder %s593_s15, 1  ;;  %p40_p7 = scmp.eq.s32.totalorder %s39_s20, 0 }
   0xf   : > { %p908_p8 = por %p56_p5, %p55_p3  ;;  %p113_p10 = scmp.eq.s32.totalorder %s594_s16, 1 }
  0x10   : > { %p912_p9 = por %p107_p6, %p49_p1  ;;  %p596_p12 = scmp.ge.s32.totalorder %s841_s14, 2 }
  0x11   : > { %s917_s23 = scalar_select %p40_p7, %s829_s11, %s42_s18  }
  0x12   : > { %p919_p11 = por %p113_p10, %p55_p3  ;;  %p630_p13 = scmp.lt.s32.totalorder %s841_s14, 2 }
  0x13   : > { %s926_s25 = sand.u32 1, %s829_s11   ;;  %s611_s27 = sshll.u32 %s837_s13, 4 }
  0x14   : > { %s597_s26 = sshll.u32 %s926_s25, 4  ;;  %s143_s30 = scalar_lea.hbm %s1056_s0, %s611_s27 }
  0x15   : > { %s137_s3 = scalar_lea.vmem [#allocation3], %s597_s26  ;;  %s144_s5 = sshll.u32 %s143_s30, 4  ;;  %s145_s5 = int_to_ptr.hbm [resolvable:$true] %s144_s5 }
  0x16   : > { %s146_s4 = sshll.u32 %s137_s3, 4  ;;  %p935_p0 = pnand %p630_p13, %p902_p4  ;;  %s147_s4 = int_to_ptr.vmem [resolvable:$true] %s146_s4 }
  0x17   : > { %p603_p1 = scmp.ge.s32.totalorder %s841_s14, 1  ;;  %s134_s7 = scalar_lea.sflag [#allocation4], %s926_s25 }
  0x18   : > { %s843_s8 = smov 128   ;;  %s844_s15 = smov 8  }
  0x19   : > { %622 = dma.hbm_to_vmem [thread:$0]  (!%p935_p0), %s145_s5, 256, %s147_s4, %s134_s7, %s843_s8, %s843_s8, %s844_s15  }
  0x1a   : > { %p177_p2 = scmp.lt.s32.totalorder %s841_s14, 3  ;;  %s166_s20 = scalar_lea.hbm %s1057_s1, %s611_s27 }
  0x1b   : > { %s167_s28 = sshll.u32 %s166_s20, 4  ;;  %s160_s19 = scalar_lea.vmem [#allocation6], %s597_s26  ;;  %s168_s28 = int_to_ptr.hbm [resolvable:$true] %s167_s28 }
  0x1c   : > { %p178_p3 = pnand %p603_p1, %p177_p2  ;;  %s169_s29 = sshll.u32 %s160_s19, 4  ;;  %s170_s29 = int_to_ptr.vmem [resolvable:$true] %s169_s29 }
  0x1d   : > { %s157_s30 = scalar_lea.sflag [#allocation7], %s926_s25  ;;  %s951_s3 = sand.u32 (!%p178_p3), 1, %s825_s10  }
  0x1e   : > { %625 = dma.hbm_to_vmem [thread:$0]  (!%p935_p0), %s168_s28, 256, %s170_s29, %s157_s30, %s843_s8, %s843_s8, %s844_s15  }
  0x1f   : > { %181 = sbr.rel (%p178_p3) target bundleno = 467 (0x1d3), region = 28  ;;  %s604_s4 = sshll.u32 (!%p178_p3), %s951_s3, 4 }
  0x20   : > { %s184_s5 = scalar_lea.sflag (!%p178_p3), [#allocation4], %s951_s3  ;;  %s187_s7 = scalar_lea.vmem (!%p178_p3), [#allocation3], %s604_s4 }
  0x24   : > { %808 = dma.done.wait (%p908_p8), %s184_s5, 256  }
  0x25   : > { %810 = vsyncadd (%p908_p8), %s184_s5, 4294967040  ;;  %s194_s25 = scalar_lea.sflag [#allocation7], %s951_s3  ;;  %s960_s26 = scalar_lea.vmem [#allocation6], %s604_s4 }
  0x26   : > { %812 = dma.done.wait (%p908_p8), %s194_s25, 256  }
  0x27   : > { %814 = vsyncadd (%p908_p8), %s194_s25, 4294967040  ;;  %v232_v0 = vld [vmem:[%s187_s7] sm:$0xff]  ;;  %v233_v1 = vld [vmem:[%s187_s7 + $0x8] sm:$0xff]  ;;  %s845_s21 = smov 127   ;;  %vm324_vm8 = vcmask 1046528   ;;  %v268_v31 = vlaneseq  ;;  %s606_s27 = sshll.u32 %s951_s3, 3 }
  0x28   : > { %v236_v2 = vmax.f32 %v232_v0, 1e-06  ;;  %v237_v3 = vmax.f32 %v233_v1, 1e-06  ;;  %v234_v18 = vld [vmem:[%s960_s26] sm:$0xff]  ;;  %v235_v25 = vld [vmem:[%s960_s26 + $0x8] sm:$0xff] }
  0x29   : > { %v269_v33 = vshrl.u32 %v268_v31, 7  ;;  %v296_v40 = vand.u32 127, %v268_v31  ;;  %s608_s6 = sshll.u32 %s833_s12, 3  ;;  %s223_s18 = scalar_lea.vmem [#allocation8], %s606_s27 }
  0x2a   : > { %683 = vrcp.f32 %v236_v2  ;;  %v249_v7 = vand.u32 2147483648, %v236_v2  ;;  %vm243_vm0 = vweird.f32 %v236_v2  ;;  %v247_v10 = vand.u32 2147483647, %v236_v2  ;;  %s485_s16 = scalar_lea.hbm %s1058_s2, %s608_s6  ;;  %s487_s20 = sshll.u32 %s223_s18, 4  ;;  %s488_s20 = int_to_ptr.vmem [resolvable:$true] %s487_s20 }
  0x2b   : > { %685 = vrcp.f32 %v237_v3  ;;  %vm258_vm2 = vweird.f32 %v237_v3  ;;  %v264_v15 = vand.u32 2147483648, %v237_v3  ;;  %v262_v17 = vand.u32 2147483647, %v237_v3  ;;  %s489_s28 = sshll.u32 %s485_s16, 4  ;;  %s475_s19 = scalar_lea.sflag [#allocation5], %s951_s3  ;;  %s490_s28 = int_to_ptr.hbm [resolvable:$true] %s489_s28 }
  0x2c   : > { %v250_v13 = vor.u32 1.1754944e-38, %v249_v7  ;;  %vm248_vm5 = vcmp.eq.f32.partialorder %v247_v10, 8.507059e+37  ;;  %v270_v34 = vadd.s32 8, %v269_v33  ;;  %v301_v41 = vand.u32 15, %v296_v40  ;;  %s769_s29 = sshra.s32 %s490_s28, 4  ;;  %s775_s5 = scalar_lea.hbm %s1058_s2, 16  ;;  %s770_s29 = int_to_ptr.hbm [resolvable:$true] %s769_s29 }
  0x2d   : > { %v265_v22 = vor.u32 1.1754944e-38, %v264_v15  ;;  %vm263_vm7 = vcmp.eq.f32.partialorder %v262_v17, 8.507059e+37  ;;  %s771_s12 = scalar_lea.hbm %s770_s29, 8  ;;  %p776_p7 = scmp.lt.s32.totalorder %s770_s29, %s1058_s2 }
  0x2e   : > { %v282_v35 = vand.u32 15, %v270_v34  ;;  %vm980_vm10 = vcmp.le.s32.totalorder %v301_v41, 14  ;;  %vm1003_vm12 = vcmp.le.s32.totalorder %v301_v41, 13  ;;  %p772_p4 = scmp.ne.s32.totalorder %s770_s29, %s771_s12  ;;  %p777_p8 = scmp.lt.s32.totalorder %s775_s5, %s771_s12 }
  0x30   : > { %v684_v4 = vpop.eup %683  ;;  %vm973_vm9 = vcmp.le.s32.totalorder %v282_v35, 14  ;;  %vm367_vm11 = vcmp.le.s32.totalorder %v282_v35, 13  ;;  %p773_p5 = pnand %p772_p4, %p912_p9  ;;  %p778_p10 = por %p777_p8, %p776_p7 }
  0x31   : > { %v686_v5 = vpop.eup %685  ;;  %v239_v6 = vmul.f32 %v684_v4, %v236_v2  ;;  %vm244_vm1 = vweird.f32 %v684_v4 }
  0x32   : > { %v254_v8 = vmul.f32 %v686_v5, %v237_v3  ;;  %vm259_vm3 = vweird.f32 %v686_v5  ;;  %vm245_vm4 = vmor %vm243_vm0, %vm244_vm1  ;;  %p774_p6 = pneg %p773_p5 }
  0x33   : > { %v240_v9 = vsub.f32 1.0, %v239_v6  ;;  %vm260_vm6 = vmor %vm258_vm2, %vm259_vm3 }
  0x34   : > { %v255_v11 = vsub.f32 1.0, %v254_v8  ;;  %p779_p13 = pnand %p778_p10, %p774_p6 }
  0x35   : > { %v241_v12 = vmul.f32 %v684_v4, %v240_v9 }
  0x36   : > { %v256_v14 = vmul.f32 %v686_v5, %v255_v11 }
  0x37   : > { %v242_v16 = vadd.f32 %v684_v4, %v241_v12 }
  0x38   : > { %v257_v19 = vadd.f32 %v686_v5, %v256_v14 }
  0x39   : > { %v246_v20 = vsel %vm245_vm4, %v684_v4, %v242_v16 }
  0x3a   : > { %v251_v21 = vsel %vm248_vm5, %v250_v13, %v246_v20  ;;  %v261_v24 = vsel %vm260_vm6, %v686_v5, %v257_v19 }
  0x3b   : > { %v252_v23 = vmul.f32 %v251_v21, %v234_v18  ;;  %v266_v26 = vsel %vm263_vm7, %v265_v22, %v261_v24 }
  0x3c   : > { %v267_v27 = vmul.f32 %v266_v26, %v235_v25 }
  0x3d   : > { %312 = vrot.lane.b32.xlu0 %v252_v23, %s845_s21  ;;  %v325_v28 = vrot.slane %v252_v23, 1 }
  0x3e   : > { %v326_v29 = vrot.slane %v267_v27, 1 }
  0x40   : > { %v327_v30 = vsel %vm324_vm8, %v325_v28, %v326_v29  ;;  %v331_v36 = vsel %vm324_vm8, %v326_v29, %v325_v28 }
  0x41   : > { %v332_v32 = vsub.f32 %v252_v23, %v327_v30  ;;  %v333_v37 = vsub.f32 %v267_v27, %v331_v36 }
  0x43   : > { %381 = vrot.lane.b32.xlu2 %v332_v32, %s845_s21  ;;  %v335_v39 = vsel %vm973_vm9, %v333_v37, 0.0  ;;  %v370_v55 = vrot.slane %v332_v32, 1 }
  0x44   : > { %v371_v54 = vrot.slane %v335_v39, 1 }
  0x45   : > { %314 = vrot.lane.b32.xlu0 %v267_v27, %s845_s21 }
  0x46   : > { %v376_v56 = vsel %vm324_vm8, %v371_v54, %v370_v55  ;;  %v372_v60 = vsel %vm324_vm8, %v370_v55, %v371_v54 }
  0x47   : > { %v378_v57 = vsub.f32 %v376_v56, %v335_v39  ;;  %v377_v62 = vsub.f32 %v372_v60, %v332_v32 }
  0x49   : > { %v380_v58 = vsel %vm367_vm11, %v378_v57, 0.0  ;;  %v391_v1 = vmul.f32 %v377_v62, %v377_v62 }
  0x4a   : > { %v392_v6 = vmul.f32 %v380_v58, %v380_v58 }
  0x4b   : > { %383 = vrot.lane.b32.xlu2 %v335_v39, %s845_s21 }
  0x9d   : > { %v382_v59 = vpop.permute.xlu2 %381 }
  0x9e   : > { %v387_v61 = vsub.f32 %v382_v59, %v332_v32 }
  0xa0   : > { %v389_v63 = vsel %vm980_vm10, %v387_v61, 0.0 }
  0xa1   : > { %v393_v2 = vmul.f32 %v389_v63, %v389_v63 }
  0xa3   : > { %v395_v4 = vadd.f32 %v393_v2, %v391_v1 }
  0xa5   : > { %v384_v0 = vpop.permute.xlu2 %383  ;;  %687 = vrsqrt.f32 %v395_v4  ;;  %vm432_vm13 = vcmp.eq.f32.partialorder %v395_v4, inf  ;;  %vm434_vm14 = vcmp.eq.f32.partialorder %v395_v4, 0.0 }
  0xa6   : > { %v388_v3 = vsub.f32 %v384_v0, %v335_v39 }
  0xa8   : > { %v390_v5 = vsel %vm980_vm10, %v388_v3, 0.0 }
  0xa9   : > { %v394_v7 = vmul.f32 %v390_v5, %v390_v5 }
  0xab   : > { %v999_v8 = vadd.f32 %v394_v7, %v392_v6  ;;  %v688_v9 = vpop.eup %687 }
  0xac   : > { %v426_v11 = vmul.f32 %v688_v9, %v395_v4 }
  0xad   : > { %689 = vrsqrt.f32 %v999_v8  ;;  %vm444_vm1 = vcmp.eq.f32.partialorder %v999_v8, inf  ;;  %v447_v58 = vand.u32 2147483648, %v999_v8  ;;  %vm446_vm2 = vcmp.eq.f32.partialorder %v999_v8, 0.0 }
  0xae   : > { %v427_v16 = vmul.f32 %v688_v9, %v426_v11 }
  0xaf   : > { %v313_v43 = vpop.permute.xlu0 %312 }
  0xb0   : > { %v318_v44 = vsub.f32 %v252_v23, %v313_v43  ;;  %v428_v22 = vmul.f32 0.5, %v427_v16  ;;  %v435_v43 = vand.u32 2147483648, %v395_v4 }
  0xb2   : > { %v320_v45 = vsel %vm980_vm10, %v318_v44, 0.0  ;;  %v429_v26 = vsub.f32 1.5, %v428_v22 }
  0xb3   : > { %350 = vrot.lane.b32.xlu1 %v320_v45, %s845_s21  ;;  %v338_v49 = vrot.slane %v320_v45, 1  ;;  %v690_v18 = vpop.eup %689 }
  0xb4   : > { %v438_v23 = vmul.f32 %v690_v18, %v999_v8  ;;  %v430_v33 = vmul.f32 %v688_v9, %v429_v26 }
  0xb6   : > { %v439_v28 = vmul.f32 %v690_v18, %v438_v23  ;;  %v431_v37 = vmul.f32 %v430_v33, %v395_v4 }
  0xb7   : > { %v315_v46 = vpop.permute.xlu0 %314 }
  0xb8   : > { %v319_v47 = vsub.f32 %v267_v27, %v315_v46  ;;  %v440_v35 = vmul.f32 0.5, %v439_v28  ;;  %v433_v42 = vsel %vm432_vm13, %v395_v4, %v431_v37 }
  0xba   : > { %v321_v48 = vsel %vm980_vm10, %v319_v47, 0.0  ;;  %v441_v39 = vsub.f32 1.5, %v440_v35 }
  0xbb   : > { %v339_v50 = vrot.slane %v321_v48, 1  ;;  %352 = vrot.lane.b32.xlu1 %v321_v48, %s845_s21 }
  0xbc   : > { %v442_v46 = vmul.f32 %v690_v18, %v441_v39 }
  0xbd   : > { %v344_v51 = vsel %vm324_vm8, %v339_v50, %v338_v49  ;;  %v340_v10 = vsel %vm324_vm8, %v338_v49, %v339_v50  ;;  %v436_v50 = vsel %vm434_vm14, %v435_v43, %v433_v42 }
  0xbe   : > { %v346_v52 = vsub.f32 %v344_v51, %v321_v48  ;;  %v345_v14 = vsub.f32 %v340_v10, %v320_v45  ;;  %v449_v56 = vmul.f32 0.00052083336, %v436_v50 }
  0xc0   : > { %v348_v53 = vsel %vm973_vm9, %v346_v52, 0.0  ;;  %v360_v19 = vmul.f32 %v345_v14, %v345_v14 }
  0xc1   : > { %v361_v29 = vmul.f32 %v348_v53, %v348_v53  ;;  %v443_v53 = vmul.f32 %v442_v46, %v999_v8 }
  0xc3   : > { %v445_v61 = vsel %vm444_vm1, %v999_v8, %v443_v53 }
  0xc4   : > { %v448_v0 = vsel %vm446_vm2, %v447_v58, %v445_v61 }
  0xc5   : > { %v450_v4 = vmul.f32 0.00052083336, %v448_v0 }
 0x125   : > { %v351_v13 = vpop.permute.xlu1 %350 }
 0x126   : > { %v356_v15 = vsub.f32 %v351_v13, %v320_v45 }
 0x128   : > { %v358_v17 = vsel %vm1003_vm12, %v356_v15, 0.0 }
 0x129   : > { %v362_v20 = vmul.f32 %v358_v17, %v358_v17 }
 0x12b   : > { %v364_v21 = vadd.f32 %v362_v20, %v360_v19 }
 0x12d   : > { %v353_v24 = vpop.permute.xlu1 %352  ;;  %691 = vrsqrt.f32 %v364_v21  ;;  %vm406_vm15 = vcmp.eq.f32.partialorder %v364_v21, inf  ;;  %v409_v49 = vand.u32 2147483648, %v364_v21  ;;  %vm408_vm0 = vcmp.eq.f32.partialorder %v364_v21, 0.0 }
 0x12e   : > { %v357_v25 = vsub.f32 %v353_v24, %v321_v48 }
 0x130   : > { %v359_v27 = vsel %vm1003_vm12, %v357_v25, 0.0 }
 0x131   : > { %v363_v30 = vmul.f32 %v359_v27, %v359_v27 }
 0x133   : > { %v692_v31 = vpop.eup %691  ;;  %v365_v32 = vadd.f32 %v363_v30, %v361_v29 }
 0x134   : > { %v400_v34 = vmul.f32 %v692_v31, %v364_v21 }
 0x135   : > { %693 = vrsqrt.f32 %v365_v32  ;;  %vm418_vm3 = vcmp.eq.f32.partialorder %v365_v32, inf  ;;  %v421_v63 = vand.u32 2147483648, %v365_v32  ;;  %vm420_vm4 = vcmp.eq.f32.partialorder %v365_v32, 0.0 }
 0x136   : > { %v401_v36 = vmul.f32 %v692_v31, %v400_v34 }
 0x138   : > { %v402_v38 = vmul.f32 0.5, %v401_v36 }
 0x13a   : > { %v403_v40 = vsub.f32 1.5, %v402_v38 }
 0x13b   : > { %v694_v41 = vpop.eup %693 }
 0x13c   : > { %v404_v44 = vmul.f32 %v692_v31, %v403_v40  ;;  %v412_v45 = vmul.f32 %v694_v41, %v365_v32 }
 0x13e   : > { %v405_v47 = vmul.f32 %v404_v44, %v364_v21  ;;  %v413_v48 = vmul.f32 %v694_v41, %v412_v45 }
 0x140   : > { %v407_v51 = vsel %vm406_vm15, %v364_v21, %v405_v47  ;;  %v414_v52 = vmul.f32 0.5, %v413_v48 }
 0x141   : > { %v410_v54 = vsel %vm408_vm0, %v409_v49, %v407_v51 }
 0x142   : > { %v423_v55 = vmul.f32 0.00052083336, %v410_v54  ;;  %v415_v57 = vsub.f32 1.5, %v414_v52 }
 0x144   : > { %v451_v59 = vadd.f32 %v449_v56, %v423_v55  ;;  %v416_v60 = vmul.f32 %v694_v41, %v415_v57 }
 0x146   : > { %462 = vadd.xlane.f32.xlu0 %v451_v59  ;;  %v417_v62 = vmul.f32 %v416_v60, %v365_v32 }
 0x148   : > { %v419_v1 = vsel %vm418_vm3, %v365_v32, %v417_v62 }
 0x149   : > { %v422_v2 = vsel %vm420_vm4, %v421_v63, %v419_v1 }
 0x14a   : > { %v424_v3 = vmul.f32 0.00052083336, %v422_v2 }
 0x14c   : > { %v452_v5 = vadd.f32 %v450_v4, %v424_v3 }
 0x14e   : > { %464 = vadd.xlane.f32.xlu1 %v452_v5 }
 0x1b9   : > { %v463_v6 = vpop.xlane.xlu0 %462 }
 0x1c1   : > { %v465_v7 = vpop.xlane.xlu1 %464 }
 0x1c2   : > { %v466_v9 = vadd.f32 %v465_v7, %v463_v6 }
 0x1c4   : > { %v467_v10 = vrot.slane %v466_v9, 4 }
 0x1c6   : > { %v468_v8 = vadd.f32 %v467_v10, %v466_v9 }
 0x1c8   : > { %v469_v11 = vrot.slane %v468_v8, 2 }
 0x1ca   : > { %v470_v12 = vadd.f32 %v469_v11, %v468_v8 }
 0x1cc   : > { %v471_v13 = vrot.slane %v470_v12, 1 }
 0x1ce   : > { %v472_v14 = vadd.f32 %v471_v13, %v470_v12 }
 0x1d0   : > { %473 = vst [vmem:[%s223_s18] sm:$0xff] %v472_v14 }
 0x1d1   : > { %782 = shalt.err (!%p779_p13)
}
 0x1d2   : > { %617 = dma.vmem_to_hbm [thread:$0]  (%p912_p9), %s488_s20, 128, %s490_s28, %s475_s19  }
 0x1d3 PF: > { %s501_s3 = sand.u32 1, %s821_s9   ;;  %p627_p0 = pnand %p596_p12, %p919_p11 }
 0x1d4   : > { %s502_s26 = scalar_lea.sflag [#allocation5], %s501_s3 }
 0x1d5   : > { %p628_p1 = pneg %p627_p0 }
 0x1d7   : > { %816 = dma.done.wait (%p628_p1), %s502_s26, 128  }
 0x1d8   : > { %818 = vsyncadd (%p628_p1), %s502_s26, 4294967168  ;;  %s21_s14 = sadd.s32 1, %s841_s14   ;;  %s1070_s9 = smov %s825_s10 }
 0x1d9   : > { %p18_p2 = scmp.ge.s32.totalorder %s21_s14, 4   ;;  %s1071_s10 = smov %s829_s11 }
 0x1da   : > { %s1072_s11 = smov %s917_s23  ;;  %s1073_s12 = smov %s837_s13 }
 0x1db   : > { %s1074_s13 = smov %s1076_s17  ;;  %20 = sbr.rel (!%p18_p2) target bundleno = 8 (0x8), region = 94 }
 0x1e0   :  { %508 = vsyncpa [#allocation4], 1 }
 0x1e1   :  { %510 = vsyncpa [#allocation4 + $0x1], 1 }
 0x1e2   :  { %511 = vsyncpa [#allocation7], 1 }
 0x1e3   :  { %513 = vsyncpa [#allocation7 + $0x1], 1 }
 0x1e4   :  { %514 = vsyncpa [#allocation5], 1 }
 0x1e5   :  { %516 = vsyncpa [#allocation5 + $0x1], 1 }

</bundles_post_ra>
